<compile_context>
chip_gen: v7x
topology: tpu7x:2x2x1
jax: 0.10.0
libtpu: 0.0.40
codegen_flags: <defaults>
</compile_context>

<pallas_src>
import jax
import jax.numpy as jnp
from jax import lax
from jax.experimental import pallas as pl
from jax.experimental.pallas import tpu as pltpu


def _round_up(x, m):
    return (x + m - 1) // m * m


# ----------------------------- tile planning --------------------------------

_VMEM_BUDGET = 40 << 20       # per-step resident-bytes target (leaves headroom on v7x 64 MiB)


def _matmul_vmem_bytes(TM, TK, Cp):
    x_blk = TM * TK * 2        # bf16 LHS tile
    w_blk = TK * Cp * 2        # bf16 RHS tile
    y_blk = TM * Cp * 2        # bf16 output tile
    st_blk = 2 * Cp * 4        # f32 stats tile
    acc = TM * Cp * 4          # f32 accumulator scratch (single-buffered)
    return 2 * (x_blk + w_blk + y_blk + st_blk) + acc


def _plan_matmul_tiles(P, Kp, Cp):
    # Row tile: target >= 4 parallel grid steps (2 per v7x TensorCore) so BlockSpec
    # double-buffering has something to overlap; fall back to 128 for tiny P.
    TM = 128
    for cand in (512, 256, 128):
        if P >= 4 * cand:
            TM = cand
            break
    # K tile: bound the resident LHS/RHS blocks when 8*Cin is large.
    if Kp <= 1024:
        TK = Kp
    else:
        TK = 128
        for cand in range(1024, 0, -128):
            if Kp % cand == 0:
                TK = cand
                break
    # Shrink the row tile until the per-step working set fits the VMEM budget.
    while TM > 128 and _matmul_vmem_bytes(TM, TK, Cp) > _VMEM_BUDGET:
        TM //= 2
    return TM, TK


def _pad2d(a, rows, cols):
    P, K = a.shape
    if rows == P and cols == K:
        return a
    return jnp.pad(a, ((0, rows - P), (0, cols - K)))


# ----------------------------- Pallas kernels ------------------------------

def _matmul_stats_kernel(x_ref, w_ref, y_ref, st_ref, acc_ref):
    k = pl.program_id(1)

    @pl.when(k == 0)
    def _():
        acc_ref[...] = jnp.zeros_like(acc_ref)

    # (TM, TK) bf16 @ (TK, Cp) bf16 -> f32 on the MXU, accumulated in VMEM scratch.
    acc_ref[...] += jnp.dot(x_ref[...], w_ref[...],
                            preferred_element_type=jnp.float32)

    @pl.when(k == pl.num_programs(1) - 1)
    def _():
        y = acc_ref[...]
        y_ref[...] = y.astype(y_ref.dtype)                    # bf16 intermediate to HBM
        s1 = jnp.sum(y, axis=0, keepdims=True)                # (1, Cp) f32
        s2 = jnp.sum(y * y, axis=0, keepdims=True)            # (1, Cp) f32
        st_ref[...] = jnp.concatenate([s1, s2], axis=0)[None]  # (1, 2, Cp)


def _bn_relu_kernel(y_ref, s_ref, b_ref, o_ref):
    # bf16 load, all elementwise math in f32 (v5e-safe), f32 store.
    y = y_ref[...].astype(jnp.float32)
    o_ref[...] = jnp.maximum(y * s_ref[...] + b_ref[...], 0.0)


def pallas_matmul_stats(col, w_col):
    """col: (P, K) bf16, w_col: (K, C) bf16.
    Returns (y_pad (Pp,Cp) bf16, stats (G,2,Cp) f32, Pp, Cp, TM)."""
    P, K = col.shape
    C = w_col.shape[1]
    Kp = _round_up(K, 128)                 # lane-dense K
    Cp = _round_up(C, 128)                 # lane-dense output columns
    TM, TK = _plan_matmul_tiles(P, Kp, Cp)
    Pp = _round_up(max(P, TM), TM)
    xb = _pad2d(col, Pp, Kp)
    wb = _pad2d(w_col, Kp, Cp)
    G = Pp // TM
    nk = Kp // TK
    vmem_limit = int(min(48 << 20, max(16 << 20, 2 * _matmul_vmem_bytes(TM, TK, Cp))))

    y_pad, stats = pl.pallas_call(
        _matmul_stats_kernel,
        out_shape=(jax.ShapeDtypeStruct((Pp, Cp), jnp.bfloat16),
                   jax.ShapeDtypeStruct((G, 2, Cp), jnp.float32)),
        grid=(G, nk),
        in_specs=[pl.BlockSpec((TM, TK), lambda i, k: (i, k)),
                  pl.BlockSpec((TK, Cp), lambda i, k: (k, 0))],
        out_specs=(pl.BlockSpec((TM, Cp), lambda i, k: (i, 0)),
                   pl.BlockSpec((1, 2, Cp), lambda i, k: (i, 0, 0))),
        scratch_shapes=[pltpu.VMEM((TM, Cp), jnp.float32)],
        compiler_params=pltpu.CompilerParams(
            dimension_semantics=("parallel", "arbitrary"),
            vmem_limit_bytes=vmem_limit),
    )(xb, wb)
    return y_pad, stats, Pp, Cp, TM


def pallas_bn_relu(y_pad, scale_cols, shift_cols, TM):
    """y_pad: (Pp, Cp) bf16; scale/shift per column (length C <= Cp). Returns f32."""
    Pp, Cp = y_pad.shape
    C = scale_cols.shape[0]
    s = jnp.zeros((1, Cp), jnp.float32).at[0, :C].set(scale_cols)
    b = jnp.zeros((1, Cp), jnp.float32).at[0, :C].set(shift_cols)
    vmem_limit = int(min(48 << 20, max(16 << 20, 4 * TM * Cp * (2 + 4))))
    return pl.pallas_call(
        _bn_relu_kernel,
        out_shape=jax.ShapeDtypeStruct((Pp, Cp), jnp.float32),
        grid=(Pp // TM,),
        in_specs=[pl.BlockSpec((TM, Cp), lambda i: (i, 0)),
                  pl.BlockSpec((1, Cp), lambda i: (0, 0)),
                  pl.BlockSpec((1, Cp), lambda i: (0, 0))],
        out_specs=pl.BlockSpec((TM, Cp), lambda i: (i, 0)),
        compiler_params=pltpu.CompilerParams(
            dimension_semantics=("parallel",),
            vmem_limit_bytes=vmem_limit),
    )(y_pad, s, b)


# ------------------------------- JAX glue -----------------------------------

# Per-dim sub-pixel map: (output phase p, input offset d) -> ConvTranspose kernel index (or -1).
#   o = 2j + p ; contribution from x[j + d] with kernel tap k, where o = 2*(j+d) - 1 + k.
_KMAP = {(0, 0): 1, (0, 1): -1, (1, 0): 2, (1, 1): 0}


def build_subpixel_weight(w_pt):
    """w_pt: (Cin, Cout, 3, 3, 3) PyTorch ConvTranspose3d layout -> (8*Cin, 8*Cout)."""
    Cin, Cout = w_pt.shape[0], w_pt.shape[1]
    phase_cols = []
    for pd in (0, 1):
        for ph in (0, 1):
            for pw in (0, 1):
                rows = []
                for dd in (0, 1):
                    for dh in (0, 1):
                        for dw in (0, 1):
                            kd, kh, kw = _KMAP[(pd, dd)], _KMAP[(ph, dh)], _KMAP[(pw, dw)]
                            if kd < 0 or kh < 0 or kw < 0:
                                rows.append(jnp.zeros((Cin, Cout), w_pt.dtype))
                            else:
                                rows.append(w_pt[:, :, kd, kh, kw])   # (Cin, Cout)
                phase_cols.append(jnp.concatenate(rows, axis=0))      # (8*Cin, Cout)
    return jnp.concatenate(phase_cols, axis=1)                        # (8*Cin, 8*Cout)


def build_subpixel_col(x_ndhwc):
    """x: (N, D, H, W, Cin) -> (N*D*H*W, 8*Cin) forward 2x2x2 neighbour window (same dtype)."""
    N, D, H, W, Cin = x_ndhwc.shape
    xp = jnp.pad(x_ndhwc, ((0, 0), (0, 1), (0, 1), (0, 1), (0, 0)))
    taps = [xp[:, dd:dd + D, dh:dh + H, dw:dw + W, :]
            for dd in (0, 1) for dh in (0, 1) for dw in (0, 1)]
    col = jnp.stack(taps, axis=-2)                  # (N, D, H, W, 8, Cin)
    return col.reshape(N * D * H * W, 8 * Cin)


def deconv_bn_relu_3d(x_ncdhw, w_pt, gamma, beta, eps=1e-5):
    """DeconvBnRelu3d forward (train-mode BatchNorm batch statistics, like PyTorch default).
    x: (N, Cin, D, H, W); w_pt: (Cin, Cout, 3, 3, 3).  Returns (N, Cout, 2D, 2H, 2W) f32."""
    N, Cin, D, H, W = x_ncdhw.shape
    Cout = w_pt.shape[1]

    # Build the 8x col expansion once, directly in bf16 (MXU input dtype).
    x = jnp.transpose(x_ncdhw, (0, 2, 3, 4, 1)).astype(jnp.bfloat16)   # NDHWC bf16
    col = build_subpixel_col(x)                                        # (P, 8*Cin) bf16
    w_col = build_subpixel_weight(w_pt.astype(jnp.bfloat16))           # (8*Cin, 8*Cout) bf16
    P = col.shape[0]
    C8 = 8 * Cout

    y_pad, stats, Pp, Cp, TM = pallas_matmul_stats(col, w_col)

    # BatchNorm training statistics from the fused per-tile f32 partials.
    # Zero-padded rows (Pp > P) contribute 0 to the sums; count uses the true P.
    col_sum = jnp.sum(stats[:, 0, :C8], axis=0)          # per (phase, channel) column sums
    col_sqs = jnp.sum(stats[:, 1, :C8], axis=0)
    ch_sum = col_sum.reshape(8, Cout).sum(axis=0)
    ch_sqs = col_sqs.reshape(8, Cout).sum(axis=0)
    count = jnp.float32(8 * P)
    mean = ch_sum / count
    var = ch_sqs / count - mean * mean                   # biased variance (PyTorch train fwd)
    var = jnp.maximum(var, 0.0)                          # guard tiny negative from cancellation
    scale = gamma * lax.rsqrt(var + eps)
    shift = beta - mean * scale

    # Broadcast per output channel across the 8 phase column blocks.
    scale8 = jnp.tile(scale, 8)
    shift8 = jnp.tile(shift, 8)

    out_pad = pallas_bn_relu(y_pad, scale8, shift8, TM)

    # Single fused permutation: interleave the 8 sub-pixel phases AND move channels first.
    # (N, D, H, W, pd, ph, pw, C) -> (N, C, D, pd, H, ph, W, pw) -> (N, C, 2D, 2H, 2W)
    y = out_pad[:P, :C8].reshape(N, D, H, W, 2, 2, 2, Cout)
    y = jnp.transpose(y, (0, 7, 1, 4, 2, 5, 3, 6))
    return y.reshape(N, Cout, 2 * D, 2 * H, 2 * W)


# --------------------------- pure-JAX reference ------------------------------

def reference_deconv_bn_relu(x, w_pt, gamma, beta, eps=1e-5):
    # ConvTranspose3d(k=3, s=2, p=1, op=1) == dilated conv with flipped/swapped kernel.
    w_f = jnp.flip(jnp.transpose(w_pt, (1, 0, 2, 3, 4)), axis=(2, 3, 4))   # (Cout, Cin, 3,3,3)
    y = lax.conv_general_dilated(
        x, w_f, window_strides=(1, 1, 1),
        padding=[(1, 2), (1, 2), (1, 2)],
        lhs_dilation=(2, 2, 2),
        dimension_numbers=("NCDHW", "OIDHW", "NCDHW"),
        precision=lax.Precision.HIGHEST)
    mean = jnp.mean(y, axis=(0, 2, 3, 4), keepdims=True)
    var = jnp.var(y, axis=(0, 2, 3, 4), keepdims=True)
    g = gamma.reshape(1, -1, 1, 1, 1)
    b = beta.reshape(1, -1, 1, 1, 1)
    return jnp.maximum((y - mean) * lax.rsqrt(var + eps) * g + b, 0.0)


# ---------------------------------- main -------------------------------------

if __name__ == "__main__":
    key = jax.random.PRNGKey(0)
    kx, kw, kg, kb = jax.random.split(key, 4)
    N, Cin, Cout, D, H, W = 2, 32, 16, 8, 8, 8
    x = jax.random.normal(kx, (N, Cin, D, H, W), jnp.float32)
    w = 0.1 * jax.random.normal(kw, (Cin, Cout, 3, 3, 3), jnp.float32)   # ConvTranspose3d layout
    gamma = 1.0 + 0.1 * jax.random.normal(kg, (Cout,), jnp.float32)
    beta = 0.1 * jax.random.normal(kb, (Cout,), jnp.float32)

    out = jax.jit(deconv_bn_relu_3d)(x, w, gamma, beta)
    out = jax.block_until_ready(out)
    assert out.shape == (N, Cout, 2 * D, 2 * H, 2 * W), out.shape
    assert bool(jnp.all(jnp.isfinite(out)))

    ref = reference_deconv_bn_relu(x, w, gamma, beta)
    max_err = float(jnp.max(jnp.abs(out - ref)))
    assert max_err < 1e-1, ("max abs err vs reference", max_err)

    print("KERNEL_OK")
</pallas_src>

<mosaic_0001>
module attributes {stable_mosaic.version = 11 : i64} {
  func.func @_matmul_stats_kernel(%arg0: i32, %arg1: i32, %arg2: memref<256x256xbf16, #tpu.memory_space<vmem>>, %arg3: memref<256x128xbf16, #tpu.memory_space<vmem>>, %arg4: memref<256x128xbf16, #tpu.memory_space<vmem>>, %arg5: memref<1x2x128xf32, #tpu.memory_space<vmem>>, %arg6: memref<256x128xf32, #tpu.memory_space<vmem>>) attributes {dimension_semantics = [#tpu.dimension_semantics<parallel>, #tpu.dimension_semantics<arbitrary>], iteration_bounds = array<i64: 4, 1>, scalar_prefetch = 0 : i64, scratch_operands = 1 : i64, tpu.core_type = #tpu.core_type<tc>, window_params = [{transform_indices = @transform_0, window_bounds = array<i64: 256, 256>}, {transform_indices = @transform_1, window_bounds = array<i64: 256, 128>}, {transform_indices = @transform_2, window_bounds = array<i64: 256, 128>}, {transform_indices = @transform_3, window_bounds = array<i64: 1, 2, 128>}]} {
    %c0_i32 = arith.constant 0 : i32
    %0 = arith.cmpi eq, %arg1, %c0_i32 : i32
    %1 = arith.extui %0 : i1 to i32
    %c0_i32_0 = arith.constant 0 : i32
    %2 = arith.cmpi ne, %1, %c0_i32_0 : i32
    scf.if %2 {
      %cst_10 = arith.constant 0.000000e+00 : f32
      %12 = vector.broadcast %cst_10 : f32 to vector<256x128xf32>
      %c0_11 = arith.constant 0 : index
      %c0_12 = arith.constant 0 : index
      %13 = vector.load %arg6[%c0_11, %c0_12] : memref<256x128xf32, #tpu.memory_space<vmem>>, vector<256x128xf32>
      tpu.vector_store %arg6[%c0_11, %c0_12], %12 {strides = array<i32>} : memref<256x128xf32, #tpu.memory_space<vmem>>, vector<256x128xf32>,
    } else {
    }
    %c0 = arith.constant 0 : index
    %c0_1 = arith.constant 0 : index
    %3 = vector.load %arg6[%c0, %c0_1] : memref<256x128xf32, #tpu.memory_space<vmem>>, vector<256x128xf32>
    %c0_2 = arith.constant 0 : index
    %c0_3 = arith.constant 0 : index
    %4 = vector.load %arg2[%c0_2, %c0_3] : memref<256x256xbf16, #tpu.memory_space<vmem>>, vector<256x256xbf16>
    %c0_4 = arith.constant 0 : index
    %c0_5 = arith.constant 0 : index
    %5 = vector.load %arg3[%c0_4, %c0_5] : memref<256x128xbf16, #tpu.memory_space<vmem>>, vector<256x128xbf16>
    %cst = arith.constant dense<0.000000e+00> : vector<256x128xf32>
    %6 = tpu.matmul %4, %5, %cst {dimension_numbers = #tpu.dot_dimension_numbers<[1], [0], [0], [1], [0, 0, 1, 1], [], []>} : vector<256x256xbf16>, vector<256x128xbf16>, vector<256x128xf32> -> vector<256x128xf32>
    %7 = arith.addf %3, %6 : vector<256x128xf32>
    %c0_6 = arith.constant 0 : index
    %c0_7 = arith.constant 0 : index
    %8 = vector.load %arg6[%c0_6, %c0_7] : memref<256x128xf32, #tpu.memory_space<vmem>>, vector<256x128xf32>
    tpu.vector_store %arg6[%c0_6, %c0_7], %7 {strides = array<i32>} : memref<256x128xf32, #tpu.memory_space<vmem>>, vector<256x128xf32>,
    %c0_i32_8 = arith.constant 0 : i32
    %9 = arith.cmpi eq, %arg1, %c0_i32_8 : i32
    %10 = arith.extui %9 : i1 to i32
    %c0_i32_9 = arith.constant 0 : i32
    %11 = arith.cmpi ne, %10, %c0_i32_9 : i32
    scf.if %11 {
      %c0_10 = arith.constant 0 : index
      %c0_11 = arith.constant 0 : index
      %12 = vector.load %arg6[%c0_10, %c0_11] : memref<256x128xf32, #tpu.memory_space<vmem>>, vector<256x128xf32>
      %13 = arith.truncf %12 : vector<256x128xf32> to vector<256x128xbf16>
      %c0_12 = arith.constant 0 : index
      %c0_13 = arith.constant 0 : index
      %14 = vector.load %arg4[%c0_12, %c0_13] : memref<256x128xbf16, #tpu.memory_space<vmem>>, vector<256x128xbf16>
      tpu.vector_store %arg4[%c0_12, %c0_13], %13 {strides = array<i32>} : memref<256x128xbf16, #tpu.memory_space<vmem>>, vector<256x128xbf16>,
      %cst_14 = arith.constant dense<0.000000e+00> : vector<128xf32>
      %15 = vector.multi_reduction <add>, %12, %cst_14 [0] : vector<256x128xf32> to vector<128xf32>
      %16 = vector.shape_cast %15 : vector<128xf32> to vector<1x128xf32>
      %17 = arith.mulf %12, %12 : vector<256x128xf32>
      %cst_15 = arith.constant dense<0.000000e+00> : vector<128xf32>
      %18 = vector.multi_reduction <add>, %17, %cst_15 [0] : vector<256x128xf32> to vector<128xf32>
      %19 = vector.shape_cast %18 : vector<128xf32> to vector<1x128xf32>
      %20 = tpu.concatenate %16, %19 in 0 : vector<1x128xf32>, vector<1x128xf32> -> vector<2x128xf32>
      %21 = vector.shape_cast %20 : vector<2x128xf32> to vector<1x2x128xf32>
      %c0_16 = arith.constant 0 : index
      %c0_17 = arith.constant 0 : index
      %c0_18 = arith.constant 0 : index
      %22 = vector.load %arg5[%c0_16, %c0_17, %c0_18] : memref<1x2x128xf32, #tpu.memory_space<vmem>>, vector<1x2x128xf32>
      tpu.vector_store %arg5[%c0_16, %c0_17, %c0_18], %21 {strides = array<i32>} : memref<1x2x128xf32, #tpu.memory_space<vmem>>, vector<1x2x128xf32>,
    } else {
    }
    return
  }
  func.func @transform_0(%arg0: i32, %arg1: i32) -> (i32, i32) {
    %c0_i32 = arith.constant 0 : i32
    return %arg0, %arg1 : i32, i32
  }
  func.func @transform_1(%arg0: i32, %arg1: i32) -> (i32, i32) {
    %c0_i32 = arith.constant 0 : i32
    %c0_i32_0 = arith.constant 0 : i32
    return %arg1, %c0_i32 : i32, i32
  }
  func.func @transform_2(%arg0: i32, %arg1: i32) -> (i32, i32) {
    %c0_i32 = arith.constant 0 : i32
    %c0_i32_0 = arith.constant 0 : i32
    return %arg0, %c0_i32 : i32, i32
  }
  func.func @transform_3(%arg0: i32, %arg1: i32) -> (i32, i32, i32) {
    %c0_i32 = arith.constant 0 : i32
    %c0_i32_0 = arith.constant 0 : i32
    %c0_i32_1 = arith.constant 0 : i32
    return %arg0, %c0_i32, %c0_i32_0 : i32, i32, i32
  }
}

module attributes {stable_mosaic.version = 11 : i64} {
  func.func @_bn_relu_kernel(%arg0: i32, %arg1: memref<256x128xbf16, #tpu.memory_space<vmem>>, %arg2: memref<1x128xf32, #tpu.memory_space<vmem>>, %arg3: memref<1x128xf32, #tpu.memory_space<vmem>>, %arg4: memref<256x128xf32, #tpu.memory_space<vmem>>) attributes {dimension_semantics = [#tpu.dimension_semantics<parallel>], iteration_bounds = array<i64: 4>, scalar_prefetch = 0 : i64, scratch_operands = 0 : i64, tpu.core_type = #tpu.core_type<tc>, window_params = [{transform_indices = @transform_0, window_bounds = array<i64: 256, 128>}, {pipeline_mode = #tpu.pipeline_mode<synchronous>, transform_indices = @transform_1, window_bounds = array<i64: 1, 128>}, {pipeline_mode = #tpu.pipeline_mode<synchronous>, transform_indices = @transform_2, window_bounds = array<i64: 1, 128>}, {transform_indices = @transform_3, window_bounds = array<i64: 256, 128>}]} {
    %c0 = arith.constant 0 : index
    %c0_0 = arith.constant 0 : index
    %0 = vector.load %arg1[%c0, %c0_0] : memref<256x128xbf16, #tpu.memory_space<vmem>>, vector<256x128xbf16>
    %1 = arith.extf %0 : vector<256x128xbf16> to vector<256x128xf32>
    %c0_1 = arith.constant 0 : index
    %c0_2 = arith.constant 0 : index
    %2 = vector.load %arg2[%c0_1, %c0_2] : memref<1x128xf32, #tpu.memory_space<vmem>>, vector<1x128xf32>
    %3 = vector.broadcast %2 : vector<1x128xf32> to vector<256x128xf32>
    %4 = arith.mulf %1, %3 : vector<256x128xf32>
    %c0_3 = arith.constant 0 : index
    %c0_4 = arith.constant 0 : index
    %5 = vector.load %arg3[%c0_3, %c0_4] : memref<1x128xf32, #tpu.memory_space<vmem>>, vector<1x128xf32>
    %6 = vector.broadcast %5 : vector<1x128xf32> to vector<256x128xf32>
    %7 = arith.addf %4, %6 : vector<256x128xf32>
    %cst = arith.constant 0.000000e+00 : f32
    %8 = vector.broadcast %cst : f32 to vector<256x128xf32>
    %9 = arith.maximumf %7, %8 : vector<256x128xf32>
    %c0_5 = arith.constant 0 : index
    %c0_6 = arith.constant 0 : index
    %10 = vector.load %arg4[%c0_5, %c0_6] : memref<256x128xf32, #tpu.memory_space<vmem>>, vector<256x128xf32>
    tpu.vector_store %arg4[%c0_5, %c0_6], %9 {strides = array<i32>} : memref<256x128xf32, #tpu.memory_space<vmem>>, vector<256x128xf32>,
    return
  }
  func.func @transform_0(%arg0: i32) -> (i32, i32) {
    %c0_i32 = arith.constant 0 : i32
    %c0_i32_0 = arith.constant 0 : i32
    return %arg0, %c0_i32 : i32, i32
  }
  func.func @transform_1(%arg0: i32) -> (i32, i32) {
    %c0_i32 = arith.constant 0 : i32
    %c0_i32_0 = arith.constant 0 : i32
    %c0_i32_1 = arith.constant 0 : i32
    return %c0_i32, %c0_i32_0 : i32, i32
  }
  func.func @transform_2(%arg0: i32) -> (i32, i32) {
    %c0_i32 = arith.constant 0 : i32
    %c0_i32_0 = arith.constant 0 : i32
    %c0_i32_1 = arith.constant 0 : i32
    return %c0_i32, %c0_i32_0 : i32, i32
  }
  func.func @transform_3(%arg0: i32) -> (i32, i32) {
    %c0_i32 = arith.constant 0 : i32
    %c0_i32_0 = arith.constant 0 : i32
    return %arg0, %c0_i32 : i32, i32
  }
}

</mosaic_0001>

<bundles_post_ra>
// kernel: tile.18
= control target key start
LH: loop header
LB: loop body
LE: loop exit
PB: predicated region body
PF: predicated region fallthrough
CT: control target
= control target key end

     0   :  { %s22_s0 = inlined_call_operand.vmem [shape: f32[16], index: 0, kind: input, shape index: {}]   ;;  %s23_s1 = inlined_call_operand.vmem [shape: f32[8,16], index: 1, kind: output, shape index: {}]  }
   0x1   :  { %v4_v0 = vld [vmem:[%s22_s0] ss:$0 sm:$0xff] }
   0x2   :  { %5 = vst [vmem:[%s23_s1] sm:$0xff] %v4_v0 }

// kernel: deconv_bn_relu_3d.2
= control target key start
LH: loop header
LB: loop body
LE: loop exit
PB: predicated region body
PF: predicated region fallthrough
CT: control target
= control target key end

     0   :  { %s1755_s12 = smov 0   ;;  %s1757_s13 = smov 0   ;;  %s1984_s0 = inlined_call_operand.vmem [shape: bf16[1024,256], index: 0, kind: input, shape index: {}]   ;;  %s1985_s1 = inlined_call_operand.vmem [shape: bf16[256,128], index: 1, kind: input, shape index: {}]   ;;  %s1986_s2 = inlined_call_operand.vmem [shape: bf16[1024,128], index: 2, kind: output, shape index: {0}]   ;;  %s1987_s3 = inlined_call_operand.vmem [shape: f32[4,2,128], index: 3, kind: output, shape index: {1}]  }
   0x1   :  { %s1759_s14 = smov 0  }
   0x2 LB: > { %s26_s15 = sadd.s32 1, %s1729_s13  ;;  %p1278_p0 = scmp.ge.s32.totalorder %s1733_s14, 1  ;;  %s1733_s14 = sphi %s1759_s14, %s14_s14   ;;  %s1729_s13 = sphi %s1757_s13, %s1989_s13   ;;  %s1725_s12 = sphi %s1755_s12, %s1988_s12  }
   0x3   : > { %p28_p1 = scmp.ge.s32.totalorder %s26_s15, 4  ;;  %p172_p2 = scmp.lt.s32.totalorder %s1733_s14, 5 }
   0x5   : > { %s1991_s15 = smov (%p28_p1, %s26_s15), 0  ;;  %p173_p3 = pnand %p1278_p0, %p172_p2 }
   0x6   : > { %v1647_v0 = vld [vmem:[%s1985_s1 + $0x40] sm:$0xff] (!%p173_p3)   ;;  %s1279_s18 = sshll.u32 (!%p173_p3), %s1725_s12, 5  ;;  %v1649_v2 = vld [vmem:[%s1985_s1 + $0x48] sm:$0xff] (!%p173_p3)   ;;  %v1651_v4 = vld [vmem:[%s1985_s1 + $0x50] sm:$0xff] (!%p173_p3)   ;;  %p234_p5 = scmp.lt.s32.totalorder (!%p173_p3), %s1725_s12, 3  ;;  %vm1153_vm0 = vcmask (!%p173_p3), 1040384  }
   0x7   : > { %176 = sbr.rel (%p173_p3) target bundleno = 362 (0x16a), region = 28  ;;  %v1648_v1 = vld [vmem:[%s1985_s1] sm:$0xff] (!%p173_p3)   ;;  %1495 = vmatprep.subr.bf16.mxu0 (!%p173_p3), %v1647_v0  ;;  %1607 = vmatprep.subr.bf16.mxu1 (!%p173_p3), %v1647_v0  ;;  %v1650_v3 = vld [vmem:[%s1985_s1 + $0x8] sm:$0xff] (!%p173_p3)   ;;  %p212_p4 = scmp.lt.s32.totalorder (!%p173_p3), %s1279_s18, 127  ;;  %v1652_v5 = vld [vmem:[%s1985_s1 + $0x10] sm:$0xff] (!%p173_p3)  }
   0x8   : > { %1496 = vmatpush3.bf16.msra.mxu0 (!%p173_p3), %v1648_v1  ;;  %1615 = vmatpush3.bf16.msra.mxu1 (!%p173_p3), %v1648_v1  ;;  %v1653_v6 = vld [vmem:[%s1985_s1 + $0x58] sm:$0xff] (!%p173_p3)   ;;  %v1655_v8 = vld [vmem:[%s1985_s1 + $0x60] sm:$0xff] (!%p173_p3)   ;;  %v1657_v10 = vld [vmem:[%s1985_s1 + $0x68] sm:$0xff] (!%p173_p3)  }
   0x9   : > { %1497 = vmatprep.subr.bf16.mxu0 (!%p173_p3), %v1649_v2  ;;  %1608 = vmatprep.subr.bf16.mxu1 (!%p173_p3), %v1649_v2  ;;  %v1654_v7 = vld [vmem:[%s1985_s1 + $0x18] sm:$0xff] (!%p173_p3)   ;;  %v1656_v9 = vld [vmem:[%s1985_s1 + $0x20] sm:$0xff] (!%p173_p3)   ;;  %v1658_v12 = vld [vmem:[%s1985_s1 + $0x28] sm:$0xff] (!%p173_p3)  }
   0xa   : > { %v1659_v13 = vld [vmem:[%s1985_s1 + $0x70] sm:$0xff] (!%p173_p3)   ;;  %v1661_v16 = vld [vmem:[%s1985_s1 + $0x78] sm:$0xff] (!%p173_p3)  }
   0xb   : > { %v1660_v15 = vld [vmem:[%s1985_s1 + $0x30] sm:$0xff] (!%p173_p3)   ;;  %v1662_v17 = vld [vmem:[%s1985_s1 + $0x38] sm:$0xff] (!%p173_p3)  }
   0xc   : > { %1498 = vmatpush3.bf16.msra.mxu0 (!%p173_p3), %v1650_v3  ;;  %1616 = vmatpush3.bf16.msra.mxu1 (!%p173_p3), %v1650_v3 }
   0xd   : > { %1499 = vmatprep.subr.bf16.mxu0 (!%p173_p3), %v1651_v4  ;;  %1609 = vmatprep.subr.bf16.mxu1 (!%p173_p3), %v1651_v4 }
   0xe   : > { %s1993_s18 = smov (!%p212_p4, %s1279_s18), 127  ;;  %s1995_s12 = smov (!%p234_p5, %s1725_s12), 3 }
   0xf   : > { %s1367_s6 = sshll.u32 %s1993_s18, 3  ;;  %s1283_s4 = sshll.u32 %s1993_s18, 2 }
  0x10   : > { %1500 = vmatpush3.bf16.msra.mxu0 %v1652_v5  ;;  %1617 = vmatpush3.bf16.msra.mxu1 %v1652_v5  ;;  %s1809_s11 = scalar_lea.vmem %s1984_s0, %s1367_s6  ;;  %s1870_s7 = scalar_lea.vmem %s1986_s2, %s1283_s4 }
  0x11   : > { %1501 = vmatprep.subr.bf16.mxu0 %v1653_v6  ;;  %1610 = vmatprep.subr.bf16.mxu1 %v1653_v6  ;;  %v1665_v11 = vld [vmem:[%s1809_s11 + $0x4] ss:$8 sps:$4 sm:$0xff]   ;;  %v1663_v18 = vld [vmem:[%s1809_s11] ss:$8 sps:$4 sm:$0xff]   ;;  %v1666_v19 = vld [vmem:[%s1809_s11 + $0x14] ss:$8 sps:$4 sm:$0xff]  }
  0x12   : > { %659 = vmatprep.mubr.bf16.mxu0 %v1665_v11  ;;  %v1677_v14 = vld [vmem:[%s1809_s11 + $0x84] ss:$8 sps:$4 sm:$0xff]   ;;  %v1675_v20 = vld [vmem:[%s1809_s11 + $0x80] ss:$8 sps:$4 sm:$0xff]   ;;  %v1681_v21 = vld [vmem:[%s1809_s11 + $0x94] ss:$8 sps:$4 sm:$0xff]  }
  0x13   : > { %723 = vmatprep.mubr.bf16.mxu1 %v1677_v14  ;;  %v1668_v22 = vld [vmem:[%s1809_s11 + $0x10] ss:$8 sps:$4 sm:$0xff]   ;;  %v1669_v23 = vld [vmem:[%s1809_s11 + $0x24] ss:$8 sps:$4 sm:$0xff]   ;;  %v1671_v26 = vld [vmem:[%s1809_s11 + $0x20] ss:$8 sps:$4 sm:$0xff]  }
  0x14   : > { %1502 = vmatpush3.bf16.msra.mxu0 %v1654_v7  ;;  %1618 = vmatpush3.bf16.msra.mxu1 %v1654_v7  ;;  %v1683_v24 = vld [vmem:[%s1809_s11 + $0x90] ss:$8 sps:$4 sm:$0xff]   ;;  %v1687_v25 = vld [vmem:[%s1809_s11 + $0xa4] ss:$8 sps:$4 sm:$0xff]   ;;  %v1672_v27 = vld [vmem:[%s1809_s11 + $0x34] ss:$8 sps:$4 sm:$0xff]  }
  0x15   : > { %1503 = vmatprep.subr.bf16.mxu0 %v1655_v8  ;;  %1611 = vmatprep.subr.bf16.mxu1 %v1655_v8  ;;  %v1689_v28 = vld [vmem:[%s1809_s11 + $0xa0] ss:$8 sps:$4 sm:$0xff]   ;;  %v1693_v29 = vld [vmem:[%s1809_s11 + $0xb4] ss:$8 sps:$4 sm:$0xff]   ;;  %v1674_v30 = vld [vmem:[%s1809_s11 + $0x30] ss:$8 sps:$4 sm:$0xff]  }
  0x16   : > { %v1678_v31 = vld [vmem:[%s1809_s11 + $0x44] ss:$8 sps:$4 sm:$0xff]   ;;  %v1695_v32 = vld [vmem:[%s1809_s11 + $0xb0] ss:$8 sps:$4 sm:$0xff]   ;;  %v1680_v34 = vld [vmem:[%s1809_s11 + $0x40] ss:$8 sps:$4 sm:$0xff]  }
  0x17   : > { %v1699_v33 = vld [vmem:[%s1809_s11 + $0xc4] ss:$8 sps:$4 sm:$0xff]   ;;  %v1684_v35 = vld [vmem:[%s1809_s11 + $0x54] ss:$8 sps:$4 sm:$0xff]   ;;  %v1701_v36 = vld [vmem:[%s1809_s11 + $0xc0] ss:$8 sps:$4 sm:$0xff]  }
  0x18   : > { %1504 = vmatpush3.bf16.msra.mxu0 %v1656_v9  ;;  %1619 = vmatpush3.bf16.msra.mxu1 %v1656_v9  ;;  %v1702_v37 = vld [vmem:[%s1809_s11 + $0xd4] ss:$8 sps:$4 sm:$0xff]   ;;  %v1686_v38 = vld [vmem:[%s1809_s11 + $0x50] ss:$8 sps:$4 sm:$0xff]   ;;  %v1690_v39 = vld [vmem:[%s1809_s11 + $0x64] ss:$8 sps:$4 sm:$0xff]  }
  0x19   : > { %1505 = vmatprep.subr.bf16.mxu0 %v1657_v10  ;;  %1612 = vmatprep.subr.bf16.mxu1 %v1657_v10  ;;  %v1704_v40 = vld [vmem:[%s1809_s11 + $0xd0] ss:$8 sps:$4 sm:$0xff]   ;;  %v1705_v41 = vld [vmem:[%s1809_s11 + $0xe4] ss:$8 sps:$4 sm:$0xff]   ;;  %v1692_v42 = vld [vmem:[%s1809_s11 + $0x60] ss:$8 sps:$4 sm:$0xff]  }
  0x1a   : > { %v1696_v43 = vld [vmem:[%s1809_s11 + $0x74] ss:$8 sps:$4 sm:$0xff]   ;;  %v1707_v44 = vld [vmem:[%s1809_s11 + $0xe0] ss:$8 sps:$4 sm:$0xff]   ;;  %v1698_v46 = vld [vmem:[%s1809_s11 + $0x70] ss:$8 sps:$4 sm:$0xff]  }
  0x1b   : > { %v1708_v45 = vld [vmem:[%s1809_s11 + $0xf4] ss:$8 sps:$4 sm:$0xff]   ;;  %v1710_v47 = vld [vmem:[%s1809_s11 + $0xf0] ss:$8 sps:$4 sm:$0xff]   ;;  %s1284_s18 = sshll.u32 %s1995_s12, 1 }
  0x1c   : > { %1506 = vmatpush3.bf16.msra.mxu0 %v1658_v12  ;;  %1620 = vmatpush3.bf16.msra.mxu1 %v1658_v12  ;;  %s237_s10 = scalar_lea.vmem %s1987_s3, %s1284_s18 }
  0x1d   : > { %1507 = vmatprep.subr.bf16.mxu0 %v1659_v13  ;;  %1613 = vmatprep.subr.bf16.mxu1 %v1659_v13 }
  0x20   : > { %1508 = vmatpush3.bf16.msra.mxu0 %v1660_v15  ;;  %1621 = vmatpush3.bf16.msra.mxu1 %v1660_v15 }
  0x21   : > { %1509 = vmatprep.subr.bf16.mxu0 %v1661_v16  ;;  %1614 = vmatprep.subr.bf16.mxu1 %v1661_v16 }
  0x24   : > { %1510 = vmatpush3.bf16.msra.mxu0 %v1662_v17  ;;  %1622 = vmatpush3.bf16.msra.mxu1 %v1662_v17 }
  0x27   : > { %660 = vmatmul.mubr.bf16.vlgmr.msra.gmra.mrb[0].mxu0 %v1663_v18  ;;  %724 = vmatmul.mubr.bf16.vlgmr.msra.gmra.mrb[0].mxu1 %v1675_v20 }
  0x28   : > { %667 = vmatprep.mubr.bf16.mxu0 %v1666_v19  ;;  %731 = vmatprep.mubr.bf16.mxu1 %v1681_v21 }
  0x2f   : > { %668 = vmatmul.mubr.bf16.gmra.mrb[4].mxu0 %v1668_v22  ;;  %732 = vmatmul.mubr.bf16.gmra.mrb[4].mxu1 %v1683_v24 }
  0x30   : > { %675 = vmatprep.mubr.bf16.mxu0 %v1669_v23  ;;  %739 = vmatprep.mubr.bf16.mxu1 %v1687_v25 }
  0x37   : > { %676 = vmatmul.mubr.bf16.gmra.mrb[8].mxu0 %v1671_v26  ;;  %740 = vmatmul.mubr.bf16.gmra.mrb[8].mxu1 %v1689_v28 }
  0x38   : > { %683 = vmatprep.mubr.bf16.mxu0 %v1672_v27  ;;  %747 = vmatprep.mubr.bf16.mxu1 %v1693_v29 }
  0x3f   : > { %684 = vmatmul.mubr.bf16.gmra.mrb[12].mxu0 %v1674_v30  ;;  %748 = vmatmul.mubr.bf16.gmra.mrb[12].mxu1 %v1695_v32 }
  0x40   : > { %691 = vmatprep.mubr.bf16.mxu0 %v1678_v31  ;;  %755 = vmatprep.mubr.bf16.mxu1 %v1699_v33 }
  0x47   : > { %692 = vmatmul.mubr.bf16.gmra.mrb[16].mxu0 %v1680_v34  ;;  %756 = vmatmul.mubr.bf16.gmra.mrb[16].mxu1 %v1701_v36 }
  0x48   : > { %699 = vmatprep.mubr.bf16.mxu0 %v1684_v35  ;;  %763 = vmatprep.mubr.bf16.mxu1 %v1702_v37 }
  0x4f   : > { %700 = vmatmul.mubr.bf16.gmra.mrb[20].mxu0 %v1686_v38  ;;  %764 = vmatmul.mubr.bf16.gmra.mrb[20].mxu1 %v1704_v40 }
  0x50   : > { %707 = vmatprep.mubr.bf16.mxu0 %v1690_v39  ;;  %771 = vmatprep.mubr.bf16.mxu1 %v1705_v41 }
  0x57   : > { %708 = vmatmul.mubr.bf16.gmra.mrb[24].mxu0 %v1692_v42  ;;  %772 = vmatmul.mubr.bf16.gmra.mrb[24].mxu1 %v1707_v44 }
  0x58   : > { %715 = vmatprep.mubr.bf16.mxu0 %v1696_v43  ;;  %779 = vmatprep.mubr.bf16.mxu1 %v1708_v45 }
  0x5f   : > { %716 = vmatmul.mubr.bf16.gmra.mrb[28].mxu0 %v1698_v46  ;;  %780 = vmatmul.mubr.bf16.gmra.mrb[28].mxu1 %v1710_v47 }
  0xfa   : > { %v1511_v48 = vpop.f32.mrb[0].mxu0  ;;  %v1559_v50 = vpop.f32.mrb[0].mxu1 }
  0xfb   : > { %v1512_v49 = vpop.f32.mrb[1].mxu0  ;;  %v1560_v53 = vpop.f32.mrb[1].mxu1 }
  0xfc   : > { %v1513_v51 = vadd.f32 %v1512_v49, %v1511_v48  ;;  %v1514_v52 = vpop.f32.mrb[2].mxu0  ;;  %v1865_v55 = vadd.f32 %v1560_v53, %v1559_v50  ;;  %v1562_v56 = vpop.f32.mrb[2].mxu1 }
  0xfd   : > { %v1515_v54 = vpop.f32.mrb[3].mxu0  ;;  %v1563_v58 = vpop.f32.mrb[3].mxu1 }
  0xfe   : > { %v1516_v57 = vadd.f32 %v1515_v54, %v1514_v52  ;;  %v1872_v59 = vadd.f32 %v1563_v58, %v1562_v56  ;;  %v1084_v60 = vmul.f32 %v1513_v51, %v1513_v51 }
 0x100   : > { %v1403_v61 = vpack.c.bf16 %v1516_v57, %v1513_v51  ;;  %v1047_v62 = vadd.f32 %v1516_v57, %v1513_v51  ;;  %v1085_v63 = vmul.f32 %v1516_v57, %v1516_v57  ;;  %v1443_v0 = vpack.c.bf16 %v1872_v59, %v1865_v55 }
 0x102   : > { %1404 = vst [vmem:[%s1870_s7] sm:$0xff] %v1403_v61   ;;  %v1116_v1 = vadd.f32 %v1085_v63, %v1084_v60  ;;  %v1517_v2 = vpop.f32.mrb[4].mxu0  ;;  %1487 = vst [vmem:[%s1870_s7 + $0x40] sm:$0xff] %v1443_v0   ;;  %v1565_v4 = vpop.f32.mrb[4].mxu1 }
 0x103   : > { %v1518_v3 = vpop.f32.mrb[5].mxu0  ;;  %v1566_v7 = vpop.f32.mrb[5].mxu1 }
 0x104   : > { %v1519_v5 = vadd.f32 %v1518_v3, %v1517_v2  ;;  %v1520_v6 = vpop.f32.mrb[6].mxu0  ;;  %v1878_v9 = vadd.f32 %v1566_v7, %v1565_v4  ;;  %v1568_v10 = vpop.f32.mrb[6].mxu1 }
 0x105   : > { %v1521_v8 = vpop.f32.mrb[7].mxu0  ;;  %v1569_v14 = vpop.f32.mrb[7].mxu1 }
 0x106   : > { %v1048_v11 = vadd.f32 %v1519_v5, %v1047_v62  ;;  %v1086_v12 = vmul.f32 %v1519_v5, %v1519_v5  ;;  %v1522_v13 = vadd.f32 %v1521_v8, %v1520_v6  ;;  %v1880_v15 = vadd.f32 %v1569_v14, %v1568_v10 }
 0x108   : > { %v1117_v16 = vadd.f32 %v1116_v1, %v1086_v12  ;;  %v1408_v17 = vpack.c.bf16 %v1522_v13, %v1519_v5  ;;  %v1049_v18 = vadd.f32 %v1522_v13, %v1048_v11  ;;  %v1087_v19 = vmul.f32 %v1522_v13, %v1522_v13 }
 0x109   : > { %v1448_v20 = vpack.c.bf16 %v1880_v15, %v1878_v9 }
 0x10a   : > { %1480 = vst [vmem:[%s1870_s7 + $0x8] sm:$0xff] %v1408_v17   ;;  %v1118_v21 = vadd.f32 %v1117_v16, %v1087_v19  ;;  %v1523_v22 = vpop.f32.mrb[8].mxu0  ;;  %v1571_v24 = vpop.f32.mrb[8].mxu1 }
 0x10b   : > { %v1524_v23 = vpop.f32.mrb[9].mxu0  ;;  %1488 = vst [vmem:[%s1870_s7 + $0x48] sm:$0xff] %v1448_v20   ;;  %v1572_v27 = vpop.f32.mrb[9].mxu1 }
 0x10c   : > { %v1525_v25 = vadd.f32 %v1524_v23, %v1523_v22  ;;  %v1526_v26 = vpop.f32.mrb[10].mxu0  ;;  %v1886_v29 = vadd.f32 %v1572_v27, %v1571_v24  ;;  %v1574_v30 = vpop.f32.mrb[10].mxu1 }
 0x10d   : > { %v1527_v28 = vpop.f32.mrb[11].mxu0  ;;  %v1575_v34 = vpop.f32.mrb[11].mxu1 }
 0x10e   : > { %v1050_v31 = vadd.f32 %v1525_v25, %v1049_v18  ;;  %v1088_v32 = vmul.f32 %v1525_v25, %v1525_v25  ;;  %v1528_v33 = vadd.f32 %v1527_v28, %v1526_v26  ;;  %v1888_v35 = vadd.f32 %v1575_v34, %v1574_v30 }
 0x110   : > { %v1119_v36 = vadd.f32 %v1118_v21, %v1088_v32  ;;  %v1413_v37 = vpack.c.bf16 %v1528_v33, %v1525_v25  ;;  %v1051_v38 = vadd.f32 %v1528_v33, %v1050_v31  ;;  %v1089_v39 = vmul.f32 %v1528_v33, %v1528_v33 }
 0x111   : > { %v1453_v40 = vpack.c.bf16 %v1888_v35, %v1886_v29 }
 0x112   : > { %1481 = vst [vmem:[%s1870_s7 + $0x10] sm:$0xff] %v1413_v37   ;;  %v1120_v41 = vadd.f32 %v1119_v36, %v1089_v39  ;;  %v1529_v42 = vpop.f32.mrb[12].mxu0  ;;  %v1577_v44 = vpop.f32.mrb[12].mxu1 }
 0x113   : > { %v1530_v43 = vpop.f32.mrb[13].mxu0  ;;  %1489 = vst [vmem:[%s1870_s7 + $0x50] sm:$0xff] %v1453_v40   ;;  %v1578_v47 = vpop.f32.mrb[13].mxu1 }
 0x114   : > { %v1531_v45 = vadd.f32 %v1530_v43, %v1529_v42  ;;  %v1532_v46 = vpop.f32.mrb[14].mxu0  ;;  %v1894_v49 = vadd.f32 %v1578_v47, %v1577_v44  ;;  %v1580_v50 = vpop.f32.mrb[14].mxu1 }
 0x115   : > { %v1533_v48 = vpop.f32.mrb[15].mxu0  ;;  %v1581_v54 = vpop.f32.mrb[15].mxu1 }
 0x116   : > { %v1052_v51 = vadd.f32 %v1531_v45, %v1051_v38  ;;  %v1090_v52 = vmul.f32 %v1531_v45, %v1531_v45  ;;  %v1534_v53 = vadd.f32 %v1533_v48, %v1532_v46  ;;  %v1896_v56 = vadd.f32 %v1581_v54, %v1580_v50 }
 0x118   : > { %v1121_v57 = vadd.f32 %v1120_v41, %v1090_v52  ;;  %v1418_v58 = vpack.c.bf16 %v1534_v53, %v1531_v45  ;;  %v1053_v60 = vadd.f32 %v1534_v53, %v1052_v51  ;;  %v1091_v61 = vmul.f32 %v1534_v53, %v1534_v53 }
 0x119   : > { %v1458_v62 = vpack.c.bf16 %v1896_v56, %v1894_v49 }
 0x11a   : > { %1482 = vst [vmem:[%s1870_s7 + $0x18] sm:$0xff] %v1418_v58   ;;  %v1122_v63 = vadd.f32 %v1121_v57, %v1091_v61  ;;  %v1535_v0 = vpop.f32.mrb[16].mxu0  ;;  %v1583_v2 = vpop.f32.mrb[16].mxu1 }
 0x11b   : > { %v1536_v1 = vpop.f32.mrb[17].mxu0  ;;  %1490 = vst [vmem:[%s1870_s7 + $0x58] sm:$0xff] %v1458_v62   ;;  %v1584_v5 = vpop.f32.mrb[17].mxu1 }
 0x11c   : > { %v1537_v3 = vadd.f32 %v1536_v1, %v1535_v0  ;;  %v1538_v4 = vpop.f32.mrb[18].mxu0  ;;  %v1902_v7 = vadd.f32 %v1584_v5, %v1583_v2  ;;  %v1586_v8 = vpop.f32.mrb[18].mxu1 }
 0x11d   : > { %v1539_v6 = vpop.f32.mrb[19].mxu0  ;;  %v1587_v13 = vpop.f32.mrb[19].mxu1 }
 0x11e   : > { %v1054_v10 = vadd.f32 %v1537_v3, %v1053_v60  ;;  %v1092_v11 = vmul.f32 %v1537_v3, %v1537_v3  ;;  %v1540_v12 = vadd.f32 %v1539_v6, %v1538_v4  ;;  %v1904_v14 = vadd.f32 %v1587_v13, %v1586_v8 }
 0x120   : > { %v1123_v16 = vadd.f32 %v1122_v63, %v1092_v11  ;;  %v1423_v17 = vpack.c.bf16 %v1540_v12, %v1537_v3  ;;  %v1055_v18 = vadd.f32 %v1540_v12, %v1054_v10  ;;  %v1093_v19 = vmul.f32 %v1540_v12, %v1540_v12 }
 0x121   : > { %v1463_v20 = vpack.c.bf16 %v1904_v14, %v1902_v7 }
 0x122   : > { %1483 = vst [vmem:[%s1870_s7 + $0x20] sm:$0xff] %v1423_v17   ;;  %v1124_v21 = vadd.f32 %v1123_v16, %v1093_v19  ;;  %v1541_v22 = vpop.f32.mrb[20].mxu0  ;;  %v1589_v24 = vpop.f32.mrb[20].mxu1 }
 0x123   : > { %v1542_v23 = vpop.f32.mrb[21].mxu0  ;;  %1491 = vst [vmem:[%s1870_s7 + $0x60] sm:$0xff] %v1463_v20   ;;  %v1590_v27 = vpop.f32.mrb[21].mxu1 }
 0x124   : > { %v1543_v25 = vadd.f32 %v1542_v23, %v1541_v22  ;;  %v1544_v26 = vpop.f32.mrb[22].mxu0  ;;  %v1910_v30 = vadd.f32 %v1590_v27, %v1589_v24  ;;  %v1592_v31 = vpop.f32.mrb[22].mxu1  ;;  %v1100_v27 = vmul.f32 %v1865_v55, %v1865_v55 }
 0x125   : > { %v1545_v28 = vpop.f32.mrb[23].mxu0  ;;  %v1593_v36 = vpop.f32.mrb[23].mxu1 }
 0x126   : > { %v1056_v32 = vadd.f32 %v1543_v25, %v1055_v18  ;;  %v1094_v33 = vmul.f32 %v1543_v25, %v1543_v25  ;;  %v1546_v34 = vadd.f32 %v1545_v28, %v1544_v26  ;;  %v1912_v37 = vadd.f32 %v1593_v36, %v1592_v31 }
 0x127   : > { %v1102_v36 = vmul.f32 %v1878_v9, %v1878_v9 }
 0x128   : > { %v1125_v38 = vadd.f32 %v1124_v21, %v1094_v33  ;;  %v1428_v39 = vpack.c.bf16 %v1546_v34, %v1543_v25  ;;  %v1057_v40 = vadd.f32 %v1546_v34, %v1056_v32  ;;  %v1095_v41 = vmul.f32 %v1546_v34, %v1546_v34 }
 0x129   : > { %v1468_v42 = vpack.c.bf16 %v1912_v37, %v1910_v30  ;;  %v1101_v32 = vmul.f32 %v1872_v59, %v1872_v59 }
 0x12a   : > { %1484 = vst [vmem:[%s1870_s7 + $0x28] sm:$0xff] %v1428_v39   ;;  %v1126_v43 = vadd.f32 %v1125_v38, %v1095_v41  ;;  %v1547_v44 = vpop.f32.mrb[24].mxu0  ;;  %v1595_v46 = vpop.f32.mrb[24].mxu1 }
 0x12b   : > { %v1548_v45 = vpop.f32.mrb[25].mxu0  ;;  %1492 = vst [vmem:[%s1870_s7 + $0x68] sm:$0xff] %v1468_v42   ;;  %v1596_v50 = vpop.f32.mrb[25].mxu1  ;;  %v1104_v42 = vmul.f32 %v1886_v29, %v1886_v29 }
 0x12c   : > { %v1549_v47 = vadd.f32 %v1548_v45, %v1547_v44  ;;  %v1550_v48 = vpop.f32.mrb[26].mxu0  ;;  %v1918_v52 = vadd.f32 %v1596_v50, %v1595_v46  ;;  %v1598_v53 = vpop.f32.mrb[26].mxu1 }
 0x12d   : > { %v1551_v51 = vpop.f32.mrb[27].mxu0  ;;  %v1599_v60 = vpop.f32.mrb[27].mxu1 }
 0x12e   : > { %v1058_v54 = vadd.f32 %v1549_v47, %v1057_v40  ;;  %v1096_v57 = vmul.f32 %v1549_v47, %v1549_v47  ;;  %v1552_v58 = vadd.f32 %v1551_v51, %v1550_v48  ;;  %v1920_v61 = vadd.f32 %v1599_v60, %v1598_v53 }
 0x12f   : > { %v1103_v40 = vmul.f32 %v1880_v15, %v1880_v15  ;;  %v1108_v53 = vmul.f32 %v1902_v7, %v1902_v7 }
 0x130   : > { %v1127_v62 = vadd.f32 %v1126_v43, %v1096_v57  ;;  %v1433_v63 = vpack.c.bf16 %v1552_v58, %v1549_v47  ;;  %v1059_v0 = vadd.f32 %v1552_v58, %v1058_v54  ;;  %v1097_v1 = vmul.f32 %v1552_v58, %v1552_v58 }
 0x131   : > { %v1473_v2 = vpack.c.bf16 %v1920_v61, %v1918_v52  ;;  %v1109_v58 = vmul.f32 %v1904_v14, %v1904_v14 }
 0x132   : > { %1485 = vst [vmem:[%s1870_s7 + $0x30] sm:$0xff] %v1433_v63   ;;  %v1128_v3 = vadd.f32 %v1127_v62, %v1097_v1  ;;  %v1553_v4 = vpop.f32.mrb[28].mxu0  ;;  %v1601_v6 = vpop.f32.mrb[28].mxu1  ;;  %v1110_v62 = vmul.f32 %v1910_v30, %v1910_v30 }
 0x133   : > { %v1554_v5 = vpop.f32.mrb[29].mxu0  ;;  %1493 = vst [vmem:[%s1870_s7 + $0x70] sm:$0xff] %v1473_v2   ;;  %v1602_v11 = vpop.f32.mrb[29].mxu1  ;;  %v1112_v2 = vmul.f32 %v1918_v52, %v1918_v52 }
 0x134   : > { %v1555_v8 = vadd.f32 %v1554_v5, %v1553_v4  ;;  %v1556_v10 = vpop.f32.mrb[30].mxu0  ;;  %v1603_v13 = vadd.f32 %v1602_v11, %v1601_v6  ;;  %v1604_v16 = vpop.f32.mrb[30].mxu1 }
 0x135   : > { %v1557_v12 = vpop.f32.mrb[31].mxu0  ;;  %v1605_v20 = vpop.f32.mrb[31].mxu1 }
 0x136   : > { %v1060_v17 = vadd.f32 %v1555_v8, %v1059_v0  ;;  %v1098_v18 = vmul.f32 %v1555_v8, %v1555_v8  ;;  %v1558_v19 = vadd.f32 %v1557_v12, %v1556_v10  ;;  %v1606_v21 = vadd.f32 %v1605_v20, %v1604_v16 }
 0x137   : > { %v1114_v4 = vmul.f32 %v1603_v13, %v1603_v13 }
 0x138   : > { %v1129_v22 = vadd.f32 %v1128_v3, %v1098_v18  ;;  %v1438_v23 = vpack.c.bf16 %v1558_v19, %v1555_v8  ;;  %v1061_v24 = vadd.f32 %v1558_v19, %v1060_v17  ;;  %v1099_v25 = vmul.f32 %v1558_v19, %v1558_v19 }
 0x139   : > { %v1478_v26 = vpack.c.bf16 %v1606_v21, %v1603_v13  ;;  %v1115_v11 = vmul.f32 %v1606_v21, %v1606_v21 }
 0x13a   : > { %1486 = vst [vmem:[%s1870_s7 + $0x38] sm:$0xff] %v1438_v23   ;;  %v1062_v28 = vadd.f32 %v1865_v55, %v1061_v24  ;;  %v1130_v31 = vadd.f32 %v1129_v22, %v1099_v25 }
 0x13b   : > { %1494 = vst [vmem:[%s1870_s7 + $0x78] sm:$0xff] %v1478_v26  }
 0x13c   : > { %v1063_v33 = vadd.f32 %v1872_v59, %v1062_v28  ;;  %v1131_v34 = vadd.f32 %v1130_v31, %v1100_v27  ;;  %v1105_v59 = vmul.f32 %v1888_v35, %v1888_v35 }
 0x13e   : > { %v1064_v38 = vadd.f32 %v1878_v9, %v1063_v33  ;;  %v1132_v39 = vadd.f32 %v1131_v34, %v1101_v32  ;;  %v1106_v9 = vmul.f32 %v1894_v49, %v1894_v49 }
 0x140   : > { %v1065_v41 = vadd.f32 %v1880_v15, %v1064_v38  ;;  %v1133_v55 = vadd.f32 %v1132_v39, %v1102_v36  ;;  %v1107_v15 = vmul.f32 %v1896_v56, %v1896_v56 }
 0x142   : > { %v1134_v43 = vadd.f32 %v1133_v55, %v1103_v40  ;;  %v1066_v44 = vadd.f32 %v1886_v29, %v1065_v41 }
 0x144   : > { %v1067_v45 = vadd.f32 %v1888_v35, %v1066_v44  ;;  %v1135_v46 = vadd.f32 %v1134_v43, %v1104_v42 }
 0x146   : > { %v1068_v47 = vadd.f32 %v1894_v49, %v1067_v45  ;;  %v1136_v48 = vadd.f32 %v1135_v46, %v1105_v59 }
 0x148   : > { %v1069_v50 = vadd.f32 %v1896_v56, %v1068_v47  ;;  %v1137_v51 = vadd.f32 %v1136_v48, %v1106_v9 }
 0x14a   : > { %v1070_v29 = vadd.f32 %v1902_v7, %v1069_v50  ;;  %v1138_v54 = vadd.f32 %v1137_v51, %v1107_v15  ;;  %v1111_v7 = vmul.f32 %v1912_v37, %v1912_v37 }
 0x14c   : > { %v1139_v35 = vadd.f32 %v1138_v54, %v1108_v53  ;;  %v1071_v57 = vadd.f32 %v1904_v14, %v1070_v29 }
 0x14e   : > { %v1140_v49 = vadd.f32 %v1139_v35, %v1109_v58  ;;  %v1072_v60 = vadd.f32 %v1910_v30, %v1071_v57  ;;  %v1113_v30 = vmul.f32 %v1920_v61, %v1920_v61 }
 0x150   : > { %v1141_v56 = vadd.f32 %v1140_v49, %v1110_v62  ;;  %v1073_v63 = vadd.f32 %v1912_v37, %v1072_v60 }
 0x152   : > { %v1142_v0 = vadd.f32 %v1141_v56, %v1111_v7  ;;  %v1074_v1 = vadd.f32 %v1918_v52, %v1073_v63 }
 0x154   : > { %v1143_v14 = vadd.f32 %v1142_v0, %v1112_v2  ;;  %v1075_v3 = vadd.f32 %v1920_v61, %v1074_v1 }
 0x156   : > { %v1144_v5 = vadd.f32 %v1143_v14, %v1113_v30  ;;  %v1076_v6 = vadd.f32 %v1603_v13, %v1075_v3 }
 0x158   : > { %v1145_v8 = vadd.f32 %v1144_v5, %v1114_v4  ;;  %v1077_v10 = vadd.f32 %v1606_v21, %v1076_v6 }
 0x15a   : > { %v1078_v37 = vrot.slane %v1077_v10, 4  ;;  %v1146_v12 = vadd.f32 %v1145_v8, %v1115_v11 }
 0x15c   : > { %v1079_v16 = vadd.f32 %v1078_v37, %v1077_v10  ;;  %v1147_v17 = vrot.slane %v1146_v12, 4 }
 0x15e   : > { %v1080_v18 = vrot.slane %v1079_v16, 2  ;;  %v1148_v52 = vadd.f32 %v1147_v17, %v1146_v12 }
 0x160   : > { %v1081_v19 = vadd.f32 %v1080_v18, %v1079_v16  ;;  %v1149_v20 = vrot.slane %v1148_v52, 2 }
 0x162   : > { %v1082_v22 = vrot.slane %v1081_v19, 1  ;;  %v1150_v23 = vadd.f32 %v1149_v20, %v1148_v52 }
 0x164   : > { %v1151_v61 = vrot.slane %v1150_v23, 1  ;;  %v1083_v13 = vadd.f32 %v1082_v22, %v1081_v19 }
 0x166   : > { %v1152_v21 = vadd.f32 %v1151_v61, %v1150_v23 }
 0x168   : > { %v1154_v24 = vsel %vm1153_vm0, %v1083_v13, %v1152_v21 }
 0x169   : > { %1155 = vst [vmem:[%s237_s10] sm:$0x3] %v1154_v24 }
 0x16a PF: > { %s14_s14 = sadd.s32 1, %s1733_s14   ;;  %s1988_s12 = smov %s1729_s13 }
 0x16b   : > { %p11_p6 = scmp.ge.s32.totalorder %s14_s14, 6   ;;  %s1989_s13 = smov %s1991_s15 }
 0x16d   :  { %13 = sbr.rel (!%p11_p6) target bundleno = 2 (0x2), region = 81 }

// kernel: deconv_bn_relu_3d.3
= control target key start
LH: loop header
LB: loop body
LE: loop exit
PB: predicated region body
PF: predicated region fallthrough
CT: control target
= control target key end

     0   :  { %s564_s12 = smov 0   ;;  %s711_s0 = inlined_call_operand.vmem [shape: bf16[1024,128], index: 0, kind: input, shape index: {}]   ;;  %s712_s1 = inlined_call_operand.vmem [shape: f32[1,128], index: 1, kind: input, shape index: {}]   ;;  %s713_s2 = inlined_call_operand.vmem [shape: f32[1,128], index: 2, kind: input, shape index: {}]   ;;  %s714_s3 = inlined_call_operand.vmem [shape: f32[1024,128], index: 3, kind: output, shape index: {}]  }
   0x1 LB: > { %s436_s13 = sadd.s32 4294967295, %s542_s12   ;;  %p440_p0 = scmp.ge.s32.totalorder %s542_s12, 1  ;;  %s542_s12 = sphi %s564_s12, %s13_s12  }
   0x2   : > { %p138_p1 = scmp.lt.s32.totalorder %s542_s12, 5 }
   0x4   : > { %p139_p2 = pnand %p440_p0, %p138_p1 }
   0x5   : > { %s441_s14 = sshll.u32 (!%p139_p2), %s436_s13, 5  ;;  %v583_v0 = vld [vmem:[%s712_s1] ss:$0 sm:$0xff] (!%p139_p2) }
   0x6   : > { %142 = sbr.rel (%p139_p2) target bundleno = 53 (0x35), region = 32  ;;  %p163_p3 = scmp.lt.s32.totalorder (!%p139_p2), %s441_s14, 127  ;;  %v592_v9 = vld [vmem:[%s713_s2] ss:$0 sm:$0xff] (!%p139_p2) }
   0xd   : > { %s716_s14 = smov (!%p163_p3, %s441_s14), 127 }
   0xe   : > { %s442_s15 = sshll.u32 %s716_s14, 2  ;;  %s444_s23 = sshll.u32 %s716_s14, 3 }
   0xf   : > { %s578_s18 = scalar_lea.vmem %s711_s0, %s442_s15  ;;  %s610_s26 = scalar_lea.vmem %s714_s3, %s444_s23 }
  0x10   : > { %v450_v1 = vld [vmem:[%s578_s18] sm:$0xff]   ;;  %v513_v2 = vld [vmem:[%s578_s18 + $0x8] sm:$0xff]   ;;  %v514_v3 = vld [vmem:[%s578_s18 + $0x10] sm:$0xff]  }
  0x11   : > { %v451_v4 = vunpack.c.l.bf16 %v450_v1  ;;  %v452_v5 = vunpack.c.h.bf16 %v450_v1  ;;  %v455_v6 = vunpack.c.l.bf16 %v513_v2  ;;  %v456_v7 = vunpack.c.h.bf16 %v513_v2  ;;  %v515_v8 = vld [vmem:[%s578_s18 + $0x18] sm:$0xff]   ;;  %v516_v30 = vld [vmem:[%s578_s18 + $0x20] sm:$0xff]   ;;  %v517_v31 = vld [vmem:[%s578_s18 + $0x28] sm:$0xff]  }
  0x12   : > { %v459_v10 = vunpack.c.l.bf16 %v514_v3  ;;  %v460_v11 = vunpack.c.h.bf16 %v514_v3  ;;  %v463_v12 = vunpack.c.l.bf16 %v515_v8  ;;  %v464_v13 = vunpack.c.h.bf16 %v515_v8  ;;  %v518_v36 = vld [vmem:[%s578_s18 + $0x30] sm:$0xff]   ;;  %v519_v37 = vld [vmem:[%s578_s18 + $0x38] sm:$0xff]   ;;  %v520_v3 = vld [vmem:[%s578_s18 + $0x40] sm:$0xff]  }
  0x13   : > { %v245_v14 = vmul.f32 %v451_v4, %v583_v0  ;;  %v246_v15 = vmul.f32 %v452_v5, %v583_v0  ;;  %v247_v16 = vmul.f32 %v455_v6, %v583_v0  ;;  %v248_v17 = vmul.f32 %v456_v7, %v583_v0  ;;  %v521_v4 = vld [vmem:[%s578_s18 + $0x48] sm:$0xff]  }
  0x14   : > { %v249_v18 = vmul.f32 %v459_v10, %v583_v0  ;;  %v250_v19 = vmul.f32 %v460_v11, %v583_v0  ;;  %v251_v20 = vmul.f32 %v463_v12, %v583_v0  ;;  %v252_v21 = vmul.f32 %v464_v13, %v583_v0  ;;  %v522_v10 = vld [vmem:[%s578_s18 + $0x50] sm:$0xff]   ;;  %v523_v11 = vld [vmem:[%s578_s18 + $0x58] sm:$0xff]  }
  0x15   : > { %v284_v22 = vadd.f32 %v592_v9, %v245_v14  ;;  %v285_v23 = vadd.f32 %v592_v9, %v246_v15  ;;  %v286_v24 = vadd.f32 %v592_v9, %v247_v16  ;;  %v287_v25 = vadd.f32 %v592_v9, %v248_v17 }
  0x16   : > { %v288_v26 = vadd.f32 %v592_v9, %v249_v18  ;;  %v289_v27 = vadd.f32 %v592_v9, %v250_v19  ;;  %v290_v28 = vadd.f32 %v592_v9, %v251_v20  ;;  %v291_v29 = vadd.f32 %v592_v9, %v252_v21 }
  0x17   : > { %v316_v32 = vmax.f32 %v284_v22, 0.0  ;;  %v317_v33 = vmax.f32 %v285_v23, 0.0  ;;  %v318_v34 = vmax.f32 %v286_v24, 0.0  ;;  %v319_v35 = vmax.f32 %v287_v25, 0.0 }
  0x18   : > { %v320_v38 = vmax.f32 %v288_v26, 0.0  ;;  %v321_v39 = vmax.f32 %v289_v27, 0.0  ;;  %v322_v40 = vmax.f32 %v290_v28, 0.0  ;;  %v323_v41 = vmax.f32 %v291_v29, 0.0 }
  0x19   : > { %348 = vst [vmem:[%s610_s26] sm:$0xff] %v316_v32  ;;  %349 = vst [vmem:[%s610_s26 + $0x8] sm:$0xff] %v317_v33  ;;  %v467_v42 = vunpack.c.l.bf16 %v516_v30  ;;  %v468_v43 = vunpack.c.h.bf16 %v516_v30  ;;  %v471_v44 = vunpack.c.l.bf16 %v517_v31  ;;  %v472_v45 = vunpack.c.h.bf16 %v517_v31 }
  0x1a   : > { %350 = vst [vmem:[%s610_s26 + $0x10] sm:$0xff] %v318_v34  ;;  %351 = vst [vmem:[%s610_s26 + $0x18] sm:$0xff] %v319_v35  ;;  %v475_v46 = vunpack.c.l.bf16 %v518_v36  ;;  %v476_v47 = vunpack.c.h.bf16 %v518_v36  ;;  %v479_v48 = vunpack.c.l.bf16 %v519_v37  ;;  %v480_v49 = vunpack.c.h.bf16 %v519_v37 }
  0x1b   : > { %352 = vst [vmem:[%s610_s26 + $0x20] sm:$0xff] %v320_v38  ;;  %353 = vst [vmem:[%s610_s26 + $0x28] sm:$0xff] %v321_v39  ;;  %v253_v50 = vmul.f32 %v467_v42, %v583_v0  ;;  %v254_v51 = vmul.f32 %v468_v43, %v583_v0  ;;  %v255_v52 = vmul.f32 %v471_v44, %v583_v0  ;;  %v483_v16 = vunpack.c.l.bf16 %v520_v3 }
  0x1c   : > { %354 = vst [vmem:[%s610_s26 + $0x30] sm:$0xff] %v322_v40  ;;  %355 = vst [vmem:[%s610_s26 + $0x38] sm:$0xff] %v323_v41  ;;  %v256_v53 = vmul.f32 %v472_v45, %v583_v0  ;;  %v257_v54 = vmul.f32 %v475_v46, %v583_v0  ;;  %v258_v55 = vmul.f32 %v476_v47, %v583_v0  ;;  %v484_v17 = vunpack.c.h.bf16 %v520_v3  ;;  %v524_v40 = vld [vmem:[%s578_s18 + $0x60] sm:$0xff]   ;;  %v525_v41 = vld [vmem:[%s578_s18 + $0x68] sm:$0xff]  }
  0x1d   : > { %v259_v56 = vmul.f32 %v479_v48, %v583_v0  ;;  %v260_v57 = vmul.f32 %v480_v49, %v583_v0  ;;  %v292_v58 = vadd.f32 %v592_v9, %v253_v50  ;;  %v293_v59 = vadd.f32 %v592_v9, %v254_v51  ;;  %v526_v46 = vld [vmem:[%s578_s18 + $0x70] sm:$0xff]   ;;  %v527_v47 = vld [vmem:[%s578_s18 + $0x78] sm:$0xff]  }
  0x1e   : > { %v294_v60 = vadd.f32 %v592_v9, %v255_v52  ;;  %v295_v61 = vadd.f32 %v592_v9, %v256_v53  ;;  %v296_v62 = vadd.f32 %v592_v9, %v257_v54  ;;  %v297_v63 = vadd.f32 %v592_v9, %v258_v55 }
  0x1f   : > { %v298_v1 = vadd.f32 %v592_v9, %v259_v56  ;;  %v299_v2 = vadd.f32 %v592_v9, %v260_v57  ;;  %v324_v5 = vmax.f32 %v292_v58, 0.0  ;;  %v325_v6 = vmax.f32 %v293_v59, 0.0 }
  0x20   : > { %v326_v7 = vmax.f32 %v294_v60, 0.0  ;;  %v327_v8 = vmax.f32 %v295_v61, 0.0  ;;  %v328_v12 = vmax.f32 %v296_v62, 0.0  ;;  %v329_v13 = vmax.f32 %v297_v63, 0.0 }
  0x21   : > { %v330_v14 = vmax.f32 %v298_v1, 0.0  ;;  %v331_v15 = vmax.f32 %v299_v2, 0.0  ;;  %356 = vst [vmem:[%s610_s26 + $0x40] sm:$0xff] %v324_v5  ;;  %357 = vst [vmem:[%s610_s26 + $0x48] sm:$0xff] %v325_v6  ;;  %v487_v18 = vunpack.c.l.bf16 %v521_v4  ;;  %v488_v19 = vunpack.c.h.bf16 %v521_v4 }
  0x22   : > { %358 = vst [vmem:[%s610_s26 + $0x50] sm:$0xff] %v326_v7  ;;  %359 = vst [vmem:[%s610_s26 + $0x58] sm:$0xff] %v327_v8  ;;  %v491_v20 = vunpack.c.l.bf16 %v522_v10  ;;  %v492_v21 = vunpack.c.h.bf16 %v522_v10  ;;  %v495_v22 = vunpack.c.l.bf16 %v523_v11  ;;  %v496_v23 = vunpack.c.h.bf16 %v523_v11 }
  0x23   : > { %360 = vst [vmem:[%s610_s26 + $0x60] sm:$0xff] %v328_v12  ;;  %361 = vst [vmem:[%s610_s26 + $0x68] sm:$0xff] %v329_v13  ;;  %v261_v24 = vmul.f32 %v483_v16, %v583_v0  ;;  %v262_v25 = vmul.f32 %v484_v17, %v583_v0  ;;  %v263_v26 = vmul.f32 %v487_v18, %v583_v0  ;;  %v499_v52 = vunpack.c.l.bf16 %v524_v40 }
  0x24   : > { %362 = vst [vmem:[%s610_s26 + $0x70] sm:$0xff] %v330_v14  ;;  %363 = vst [vmem:[%s610_s26 + $0x78] sm:$0xff] %v331_v15  ;;  %v264_v27 = vmul.f32 %v488_v19, %v583_v0  ;;  %v265_v28 = vmul.f32 %v491_v20, %v583_v0  ;;  %v266_v29 = vmul.f32 %v492_v21, %v583_v0  ;;  %v500_v53 = vunpack.c.h.bf16 %v524_v40 }
  0x25   : > { %v267_v30 = vmul.f32 %v495_v22, %v583_v0  ;;  %v268_v31 = vmul.f32 %v496_v23, %v583_v0  ;;  %v300_v32 = vadd.f32 %v592_v9, %v261_v24  ;;  %v301_v33 = vadd.f32 %v592_v9, %v262_v25 }
  0x26   : > { %v302_v34 = vadd.f32 %v592_v9, %v263_v26  ;;  %v303_v35 = vadd.f32 %v592_v9, %v264_v27  ;;  %v304_v36 = vadd.f32 %v592_v9, %v265_v28  ;;  %v305_v37 = vadd.f32 %v592_v9, %v266_v29 }
  0x27   : > { %v306_v38 = vadd.f32 %v592_v9, %v267_v30  ;;  %v307_v39 = vadd.f32 %v592_v9, %v268_v31  ;;  %v332_v42 = vmax.f32 %v300_v32, 0.0  ;;  %v333_v43 = vmax.f32 %v301_v33, 0.0 }
  0x28   : > { %v334_v44 = vmax.f32 %v302_v34, 0.0  ;;  %v335_v45 = vmax.f32 %v303_v35, 0.0  ;;  %v336_v48 = vmax.f32 %v304_v36, 0.0  ;;  %v337_v49 = vmax.f32 %v305_v37, 0.0 }
  0x29   : > { %v338_v50 = vmax.f32 %v306_v38, 0.0  ;;  %v339_v51 = vmax.f32 %v307_v39, 0.0  ;;  %364 = vst [vmem:[%s610_s26 + $0x80] sm:$0xff] %v332_v42  ;;  %365 = vst [vmem:[%s610_s26 + $0x88] sm:$0xff] %v333_v43  ;;  %v503_v54 = vunpack.c.l.bf16 %v525_v41  ;;  %v504_v55 = vunpack.c.h.bf16 %v525_v41 }
  0x2a   : > { %366 = vst [vmem:[%s610_s26 + $0x90] sm:$0xff] %v334_v44  ;;  %367 = vst [vmem:[%s610_s26 + $0x98] sm:$0xff] %v335_v45  ;;  %v507_v56 = vunpack.c.l.bf16 %v526_v46  ;;  %v508_v57 = vunpack.c.h.bf16 %v526_v46  ;;  %v511_v58 = vunpack.c.l.bf16 %v527_v47  ;;  %v512_v59 = vunpack.c.h.bf16 %v527_v47 }
  0x2b   : > { %368 = vst [vmem:[%s610_s26 + $0xa0] sm:$0xff] %v336_v48  ;;  %369 = vst [vmem:[%s610_s26 + $0xa8] sm:$0xff] %v337_v49  ;;  %v269_v60 = vmul.f32 %v499_v52, %v583_v0  ;;  %v270_v61 = vmul.f32 %v500_v53, %v583_v0  ;;  %v271_v62 = vmul.f32 %v503_v54, %v583_v0 }
  0x2c   : > { %370 = vst [vmem:[%s610_s26 + $0xb0] sm:$0xff] %v338_v50  ;;  %371 = vst [vmem:[%s610_s26 + $0xb8] sm:$0xff] %v339_v51  ;;  %v272_v63 = vmul.f32 %v504_v55, %v583_v0  ;;  %v273_v1 = vmul.f32 %v507_v56, %v583_v0  ;;  %v274_v2 = vmul.f32 %v508_v57, %v583_v0 }
  0x2d   : > { %v275_v3 = vmul.f32 %v511_v58, %v583_v0  ;;  %v276_v4 = vmul.f32 %v512_v59, %v583_v0  ;;  %v308_v5 = vadd.f32 %v592_v9, %v269_v60  ;;  %v309_v6 = vadd.f32 %v592_v9, %v270_v61 }
  0x2e   : > { %v310_v7 = vadd.f32 %v592_v9, %v271_v62  ;;  %v311_v8 = vadd.f32 %v592_v9, %v272_v63  ;;  %v312_v10 = vadd.f32 %v592_v9, %v273_v1  ;;  %v313_v11 = vadd.f32 %v592_v9, %v274_v2 }
  0x2f   : > { %v314_v0 = vadd.f32 %v592_v9, %v275_v3  ;;  %v315_v12 = vadd.f32 %v592_v9, %v276_v4  ;;  %v340_v13 = vmax.f32 %v308_v5, 0.0  ;;  %v341_v14 = vmax.f32 %v309_v6, 0.0 }
  0x30   : > { %v342_v15 = vmax.f32 %v310_v7, 0.0  ;;  %v343_v16 = vmax.f32 %v311_v8, 0.0  ;;  %v344_v17 = vmax.f32 %v312_v10, 0.0  ;;  %v345_v18 = vmax.f32 %v313_v11, 0.0 }
  0x31   : > { %v346_v19 = vmax.f32 %v314_v0, 0.0  ;;  %v347_v20 = vmax.f32 %v315_v12, 0.0  ;;  %372 = vst [vmem:[%s610_s26 + $0xc0] sm:$0xff] %v340_v13  ;;  %373 = vst [vmem:[%s610_s26 + $0xc8] sm:$0xff] %v341_v14 }
  0x32   : > { %374 = vst [vmem:[%s610_s26 + $0xd0] sm:$0xff] %v342_v15  ;;  %375 = vst [vmem:[%s610_s26 + $0xd8] sm:$0xff] %v343_v16 }
  0x33   : > { %376 = vst [vmem:[%s610_s26 + $0xe0] sm:$0xff] %v344_v17  ;;  %377 = vst [vmem:[%s610_s26 + $0xe8] sm:$0xff] %v345_v18 }
  0x34   : > { %378 = vst [vmem:[%s610_s26 + $0xf0] sm:$0xff] %v346_v19  ;;  %379 = vst [vmem:[%s610_s26 + $0xf8] sm:$0xff] %v347_v20 }
  0x35 PF: > { %s13_s12 = sadd.s32 1, %s542_s12  }
  0x36   : > { %p10_p4 = scmp.ge.s32.totalorder %s13_s12, 6  }
  0x38   :  { %12 = sbr.rel (!%p10_p4) target bundleno = 1 (0x1), region = 62 }

</bundles_post_ra>
